<compile_context>
chip_gen: v7x
topology: tpu7x:2x2x1
jax: 0.10.0
libtpu: 0.0.40
codegen_flags: <defaults>
</compile_context>

<pallas_src>
import jax
import jax.numpy as jnp
from jax.experimental import pallas as pl
from jax.experimental.pallas import tpu as pltpu

LEAKY_SLOPE = 0.01
BN_EPS = 1e-5
OUT_PAD = 128  # lane-padded width of the fc2 "difference" weights (real classes = 2)


def _cdiv(a, b):
    return -(-a // b)


def _round_up(n, m):
    return ((n + m - 1) // m) * m


# ----------------------------------------------------------------------------
# Kernel
# ----------------------------------------------------------------------------
def domain_classifier_kernel(x_ref, w1_ref, b1_ref, w2d_ref, b2d_ref, out_ref,
                             h_acc):
    # x_ref   : (TB, TK)       bf16 input tile (rows on sublanes, features on lanes)
    # w1_ref  : (TK, H_pad)    bf16 BN-folded, pre-transposed fc1 weight K-slice
    # b1_ref  : (1, H_pad)     f32 BN-folded fc1 bias
    # w2d_ref : (H_pad, 128)   bf16 logit-diff weights (lane0: z1-z0, lane1: z0-z1)
    # b2d_ref : (1, 128)       f32 logit-diff bias (lanes >= 2 are zero)
    # out_ref : (TB, 2)        f32 log-prob tile
    # h_acc   : (TB, H_pad)    f32 fc1 accumulator scratch (lives across the K axis)
    k = pl.program_id(1)

    @pl.when(k == 0)
    def _init():
        h_acc[...] = jnp.zeros_like(h_acc)

    # fc1 (+ folded BatchNorm), K-tiled: bf16 MXU matmul, f32 accumulation.
    h_acc[...] += jnp.dot(x_ref[...], w1_ref[...],
                          preferred_element_type=jnp.float32)

    @pl.when(k == pl.num_programs(1) - 1)
    def _finalize():
        h = h_acc[...] + b1_ref[...]
        h = jnp.where(h > 0, h, LEAKY_SLOPE * h)       # LeakyReLU
        # Dropout: identity in eval mode.

        # fc2 expressed as signed logit differences:
        #   s[:, 0] = z1 - z0,  s[:, 1] = z0 - z1,  s[:, 2:] = 0
        s = jnp.dot(h.astype(w2d_ref.dtype), w2d_ref[...],
                    preferred_element_type=jnp.float32) + b2d_ref[...]
        d = s[:, :2]

        # Analytic 2-class log_softmax: logp_i = -softplus(z_other - z_i),
        # stable softplus = max(d, 0) + log1p(exp(-|d|)); EUP only, no
        # cross-lane reduction.
        sp = jnp.maximum(d, 0.0) + jnp.log1p(jnp.exp(-jnp.abs(d)))
        out_ref[...] = (-sp).astype(out_ref.dtype)


# ----------------------------------------------------------------------------
# One-time parameter preparation (fold BN, pre-transpose, pad, bf16 cast)
# ----------------------------------------------------------------------------
def prepare_params(params):
    H, D = params["w1"].shape
    D_pad = _round_up(D, 128)
    H_pad = _round_up(H, 128)

    # Fold eval-mode BatchNorm into fc1:
    #   scale = gamma / sqrt(var + eps)
    #   W1'   = scale[:, None] * W1
    #   b1'   = (b1 - running_mean) * scale + beta
    scale = (params["gamma"] / jnp.sqrt(params["running_var"] + BN_EPS)).reshape(H)
    w1f = (params["w1"] * scale[:, None]).T            # (D, H), pre-transposed for MXU
    b1f = (params["b1"].reshape(H) - params["running_mean"].reshape(H)) * scale \
        + params["beta"].reshape(H)

    # fc2 as logit differences for the analytic 2-class log_softmax.
    w2 = params["w2"]                                   # (2, H)
    b2 = params["b2"].reshape(2)
    wd = jnp.stack([w2[1] - w2[0], w2[0] - w2[1]], axis=1)   # (H, 2)
    bd = jnp.stack([b2[1] - b2[0], b2[0] - b2[1]])           # (2,)

    # Lane/sublane zero-padding; matmul operands in bf16, biases stay f32.
    w1f_p = jnp.zeros((D_pad, H_pad), jnp.bfloat16).at[:D, :H].set(
        w1f.astype(jnp.bfloat16))
    b1f_p = jnp.zeros((1, H_pad), jnp.float32).at[0, :H].set(b1f)
    w2d_p = jnp.zeros((H_pad, OUT_PAD), jnp.bfloat16).at[:H, :2].set(
        wd.astype(jnp.bfloat16))
    b2d_p = jnp.zeros((1, OUT_PAD), jnp.float32).at[0, :2].set(bd)

    return {"w1f": w1f_p, "b1f": b1f_p, "w2d": w2d_p, "b2d": b2d_p,
            "D": D, "H": H, "D_pad": D_pad, "H_pad": H_pad}


# ----------------------------------------------------------------------------
# Tiling / VMEM budgeting
# ----------------------------------------------------------------------------
def _choose_tiles(B, D_pad, H_pad):
    # Batch tile: balanced across grid steps (avoids an 83%-dead trailing
    # tile), multiple of 16 for bf16 sublane packing, capped so the fc1
    # accumulator (TB x H_pad f32) stays modest.
    cap = 512 if H_pad <= 4096 else 256
    n_bt = max(1, _cdiv(B, cap))
    TB = _round_up(_cdiv(B, n_bt), 16)

    # K tile: keep the fc1 weight fully VMEM-resident (fetched once per
    # core) unless it would blow the per-core budget (v7x: 64 MiB/TC);
    # then grid-tile the contraction dimension.
    if D_pad * H_pad * 2 <= 16 * 1024 * 1024:
        TK = D_pad
    elif D_pad % 512 == 0:
        TK = 512
    elif D_pad % 256 == 0:
        TK = 256
    else:
        TK = 128
    return TB, TK


def _vmem_limit_bytes(TB, TK, H_pad, nk):
    need = (
        2 * TB * TK * 2                            # x tile, double-buffered, bf16
        + (1 if nk == 1 else 2) * TK * H_pad * 2   # fc1 weight (single-buf when resident)
        + H_pad * 4                                # b1 (f32)
        + H_pad * OUT_PAD * 2 + OUT_PAD * 4        # fc2 diff weight + bias
        + 2 * TB * 2 * 4                           # output tile, double-buffered
        + TB * H_pad * 4                           # fc1 accumulator scratch
        + 3 * TB * H_pad * 4                       # epilogue temporaries headroom
    )
    return min(64 * 1024 * 1024, max(32 * 1024 * 1024, int(need * 1.5)))


# ----------------------------------------------------------------------------
# Forward wrapper
# ----------------------------------------------------------------------------
def domain_classifier_forward(x, prep, lambda_=1.0):
    """x: (B, D) float32. prep: output of prepare_params. lambda_: grad-reversal
    scale (forward pass is identity)."""
    del lambda_  # GradientReversal is identity in the forward pass.

    B, D = x.shape
    assert D == prep["D"]
    D_pad, H_pad = prep["D_pad"], prep["H_pad"]

    # Feature lanes must be explicit zeros (garbage lanes could be NaN and
    # NaN*0 would poison fc1); fuse the pad with the bf16 downcast. Batch rows
    # are NOT padded: the grid uses cdiv and the last (partial) block's
    # out-of-range rows are row-independent garbage masked out on store.
    if D_pad != D:
        x_in = jnp.zeros((B, D_pad), jnp.bfloat16).at[:, :D].set(
            x.astype(jnp.bfloat16))
    else:
        x_in = x.astype(jnp.bfloat16)

    TB, TK = _choose_tiles(B, D_pad, H_pad)
    nb = _cdiv(B, TB)       # >= 2 steps lets v7x's two TCs both get work
    nk = D_pad // TK
    grid = (nb, nk)
    vmem_limit = _vmem_limit_bytes(TB, TK, H_pad, nk)

    cost = pl.CostEstimate(
        flops=2 * B * D_pad * H_pad + 2 * B * H_pad * OUT_PAD,
        transcendentals=4 * B,
        bytes_accessed=(x_in.size * 2 + prep["w1f"].size * 2
                        + prep["b1f"].size * 4 + prep["w2d"].size * 2
                        + prep["b2d"].size * 4 + B * 2 * 4),
    )

    def run(use_buffered):
        def spec(shape, imap, constant=False):
            if use_buffered and constant:
                # Constant index_map -> never re-fetched; the second pipeline
                # buffer is pure VMEM waste.
                return pl.BlockSpec(shape, imap, pipeline_mode=pl.Buffered(1))
            return pl.BlockSpec(shape, imap)

        return pl.pallas_call(
            domain_classifier_kernel,
            out_shape=jax.ShapeDtypeStruct((B, 2), jnp.float32),
            grid=grid,
            in_specs=[
                spec((TB, TK), lambda i, k: (i, k)),                        # x tile
                spec((TK, H_pad), lambda i, k: (0, k), constant=(nk == 1)),  # fc1 (folded)
                spec((1, H_pad), lambda i, k: (0, 0), constant=True),        # b1 (folded)
                spec((H_pad, OUT_PAD), lambda i, k: (0, 0), constant=True),  # fc2 diff W
                spec((1, OUT_PAD), lambda i, k: (0, 0), constant=True),      # fc2 diff b
            ],
            out_specs=pl.BlockSpec((TB, 2), lambda i, k: (i, 0)),
            scratch_shapes=[pltpu.VMEM((TB, H_pad), jnp.float32)],
            compiler_params=pltpu.CompilerParams(
                dimension_semantics=("parallel", "arbitrary"),
                vmem_limit_bytes=vmem_limit),
            cost_estimate=cost,
        )(x_in, prep["w1f"], prep["b1f"], prep["w2d"], prep["b2d"])

    try:
        return run(use_buffered=True)
    except Exception:
        # Fallback for jax versions without BlockSpec pipeline_mode /
        # Buffered(1): identical math, default double-buffered constants.
        return run(use_buffered=False)


# ----------------------------------------------------------------------------
# Synthetic parameters + pure-JAX reference (mirrors the torch module)
# ----------------------------------------------------------------------------
def init_params(key, input_dim):
    hidden = input_dim // 2
    k1, k2, k3, k4, k5, k6, k7, k8 = jax.random.split(key, 8)
    bound1 = 1.0 / jnp.sqrt(input_dim)
    bound2 = 1.0 / jnp.sqrt(hidden)
    return {
        "w1": jax.random.uniform(k1, (hidden, input_dim), jnp.float32,
                                 -bound1, bound1),
        "b1": jax.random.uniform(k2, (1, hidden), jnp.float32, -bound1, bound1),
        # Non-trivial BN stats so the fold is actually exercised.
        "gamma": jax.random.uniform(k5, (1, hidden), jnp.float32, 0.5, 1.5),
        "beta": 0.1 * jax.random.normal(k6, (1, hidden), jnp.float32),
        "running_mean": 0.1 * jax.random.normal(k7, (1, hidden), jnp.float32),
        "running_var": jax.random.uniform(k8, (1, hidden), jnp.float32, 0.5, 1.5),
        "w2": jax.random.uniform(k3, (2, hidden), jnp.float32, -bound2, bound2),
        "b2": jax.random.uniform(k4, (1, 2), jnp.float32, -bound2, bound2),
    }


def reference_forward(x, params):
    """Pure-JAX f32 reference with the unfused eval-mode semantics."""
    h = x @ params["w1"].T + params["b1"]
    h = (h - params["running_mean"]) / jnp.sqrt(params["running_var"] + BN_EPS)
    h = h * params["gamma"] + params["beta"]
    h = jnp.where(h > 0, h, LEAKY_SLOPE * h)
    logits = h @ params["w2"].T + params["b2"]
    return jax.nn.log_softmax(logits, axis=1)


if __name__ == "__main__":
    key = jax.random.PRNGKey(0)
    kx, kp = jax.random.split(key)

    batch = 8
    input_dim = 32          # -> hidden = 16, output classes = 2

    x = jax.random.normal(kx, (batch, input_dim), jnp.float32)
    params = init_params(kp, input_dim)
    prep = prepare_params(params)   # one-time: fold BN, transpose, pad, bf16
    lambda_ = 1.0                   # grad-reversal scale; forward is identity

    out = domain_classifier_forward(x, prep, lambda_)
    out = jax.block_until_ready(out)

    ref = reference_forward(x, params)
    assert out.shape == (batch, 2)
    # Inputs/weights stream in bf16 (f32 accumulation), so tolerance vs the
    # f32 reference is loosened accordingly.
    assert jnp.allclose(out, ref, atol=7.5e-2, rtol=2e-2), "mismatch vs reference"
    # log_softmax rows must exponentiate-sum to 1 (epilogue is f32 -> tight).
    assert jnp.allclose(jnp.sum(jnp.exp(out), axis=1), 1.0, atol=1e-5)

    print("KERNEL_OK")
</pallas_src>

<mosaic_0001>
module attributes {stable_mosaic.version = 11 : i64} {
  func.func @domain_classifier_kernel(%arg0: i32, %arg1: i32, %arg2: memref<16x128xbf16, #tpu.memory_space<vmem>>, %arg3: memref<128x128xbf16, #tpu.memory_space<vmem>>, %arg4: memref<1x128xf32, #tpu.memory_space<vmem>>, %arg5: memref<128x128xbf16, #tpu.memory_space<vmem>>, %arg6: memref<1x128xf32, #tpu.memory_space<vmem>>, %arg7: memref<16x2xf32, #tpu.memory_space<vmem>>, %arg8: memref<16x128xf32, #tpu.memory_space<vmem>>) attributes {dimension_semantics = [#tpu.dimension_semantics<parallel>, #tpu.dimension_semantics<arbitrary>], iteration_bounds = array<i64: 1, 1>, scalar_prefetch = 0 : i64, scratch_operands = 1 : i64, tpu.core_type = #tpu.core_type<tc>, window_params = [{transform_indices = @transform_0, window_bounds = array<i64: 16, 128>}, {pipeline_mode = #tpu.pipeline_mode<synchronous>, transform_indices = @transform_1, window_bounds = array<i64: 128, 128>}, {pipeline_mode = #tpu.pipeline_mode<synchronous>, transform_indices = @transform_2, window_bounds = array<i64: 1, 128>}, {pipeline_mode = #tpu.pipeline_mode<synchronous>, transform_indices = @transform_3, window_bounds = array<i64: 128, 128>}, {pipeline_mode = #tpu.pipeline_mode<synchronous>, transform_indices = @transform_4, window_bounds = array<i64: 1, 128>}, {transform_indices = @transform_5, window_bounds = array<i64: 16, 2>}]} {
    %c0_i32 = arith.constant 0 : i32
    %0 = arith.cmpi eq, %arg1, %c0_i32 : i32
    %1 = arith.extui %0 : i1 to i32
    %c0_i32_0 = arith.constant 0 : i32
    %2 = arith.cmpi ne, %1, %c0_i32_0 : i32
    scf.if %2 {
      %cst_10 = arith.constant 0.000000e+00 : f32
      %12 = vector.broadcast %cst_10 : f32 to vector<16x128xf32>
      %c0_11 = arith.constant 0 : index
      %c0_12 = arith.constant 0 : index
      %13 = vector.load %arg8[%c0_11, %c0_12] : memref<16x128xf32, #tpu.memory_space<vmem>>, vector<16x128xf32>
      tpu.vector_store %arg8[%c0_11, %c0_12], %12 {strides = array<i32>} : memref<16x128xf32, #tpu.memory_space<vmem>>, vector<16x128xf32>,
    } else {
    }
    %c0 = arith.constant 0 : index
    %c0_1 = arith.constant 0 : index
    %3 = vector.load %arg8[%c0, %c0_1] : memref<16x128xf32, #tpu.memory_space<vmem>>, vector<16x128xf32>
    %c0_2 = arith.constant 0 : index
    %c0_3 = arith.constant 0 : index
    %4 = vector.load %arg2[%c0_2, %c0_3] : memref<16x128xbf16, #tpu.memory_space<vmem>>, vector<16x128xbf16>
    %c0_4 = arith.constant 0 : index
    %c0_5 = arith.constant 0 : index
    %5 = vector.load %arg3[%c0_4, %c0_5] : memref<128x128xbf16, #tpu.memory_space<vmem>>, vector<128x128xbf16>
    %cst = arith.constant dense<0.000000e+00> : vector<16x128xf32>
    %6 = tpu.matmul %4, %5, %cst {dimension_numbers = #tpu.dot_dimension_numbers<[1], [0], [0], [1], [0, 0, 1, 1], [], []>} : vector<16x128xbf16>, vector<128x128xbf16>, vector<16x128xf32> -> vector<16x128xf32>
    %7 = arith.addf %3, %6 : vector<16x128xf32>
    %c0_6 = arith.constant 0 : index
    %c0_7 = arith.constant 0 : index
    %8 = vector.load %arg8[%c0_6, %c0_7] : memref<16x128xf32, #tpu.memory_space<vmem>>, vector<16x128xf32>
    tpu.vector_store %arg8[%c0_6, %c0_7], %7 {strides = array<i32>} : memref<16x128xf32, #tpu.memory_space<vmem>>, vector<16x128xf32>,
    %c0_i32_8 = arith.constant 0 : i32
    %9 = arith.cmpi eq, %arg1, %c0_i32_8 : i32
    %10 = arith.extui %9 : i1 to i32
    %c0_i32_9 = arith.constant 0 : i32
    %11 = arith.cmpi ne, %10, %c0_i32_9 : i32
    scf.if %11 {
      %c0_10 = arith.constant 0 : index
      %c0_11 = arith.constant 0 : index
      %12 = vector.load %arg8[%c0_10, %c0_11] : memref<16x128xf32, #tpu.memory_space<vmem>>, vector<16x128xf32>
      %c0_12 = arith.constant 0 : index
      %c0_13 = arith.constant 0 : index
      %13 = vector.load %arg4[%c0_12, %c0_13] : memref<1x128xf32, #tpu.memory_space<vmem>>, vector<1x128xf32>
      %14 = vector.broadcast %13 : vector<1x128xf32> to vector<16x128xf32>
      %15 = arith.addf %12, %14 : vector<16x128xf32>
      %cst_14 = arith.constant 0.000000e+00 : f32
      %16 = vector.broadcast %cst_14 : f32 to vector<16x128xf32>
      %17 = arith.cmpf ogt, %15, %16 : vector<16x128xf32>
      %cst_15 = arith.constant 0.00999999977 : f32
      %18 = vector.broadcast %cst_15 : f32 to vector<16x128xf32>
      %19 = arith.mulf %18, %15 : vector<16x128xf32>
      %20 = arith.select %17, %15, %19 : vector<16x128xi1>, vector<16x128xf32>
      %21 = arith.truncf %20 : vector<16x128xf32> to vector<16x128xbf16>
      %c0_16 = arith.constant 0 : index
      %c0_17 = arith.constant 0 : index
      %22 = vector.load %arg5[%c0_16, %c0_17] : memref<128x128xbf16, #tpu.memory_space<vmem>>, vector<128x128xbf16>
      %cst_18 = arith.constant dense<0.000000e+00> : vector<16x128xf32>
      %23 = tpu.matmul %21, %22, %cst_18 {dimension_numbers = #tpu.dot_dimension_numbers<[1], [0], [0], [1], [0, 0, 1, 1], [], []>} : vector<16x128xbf16>, vector<128x128xbf16>, vector<16x128xf32> -> vector<16x128xf32>
      %c0_19 = arith.constant 0 : index
      %c0_20 = arith.constant 0 : index
      %24 = vector.load %arg6[%c0_19, %c0_20] : memref<1x128xf32, #tpu.memory_space<vmem>>, vector<1x128xf32>
      %25 = vector.broadcast %24 : vector<1x128xf32> to vector<16x128xf32>
      %26 = arith.addf %23, %25 : vector<16x128xf32>
      %27 = vector.extract_strided_slice %26 {offsets = [0, 0], sizes = [16, 2], strides = [1, 1]} : vector<16x128xf32> to vector<16x2xf32>
      %cst_21 = arith.constant 0.000000e+00 : f32
      %28 = vector.broadcast %cst_21 : f32 to vector<16x2xf32>
      %29 = arith.maximumf %27, %28 : vector<16x2xf32>
      %30 = math.absf %27 : vector<16x2xf32>
      %cst_22 = arith.constant 0.000000e+00 : f32
      %31 = vector.broadcast %cst_22 : f32 to vector<16x2xf32>
      %32 = arith.subf %31, %30 : vector<16x2xf32>
      %33 = math.exp %32 : vector<16x2xf32>
      %34 = math.log1p %33 : vector<16x2xf32>
      %35 = arith.addf %29, %34 : vector<16x2xf32>
      %cst_23 = arith.constant 0.000000e+00 : f32
      %36 = vector.broadcast %cst_23 : f32 to vector<16x2xf32>
      %37 = arith.subf %36, %35 : vector<16x2xf32>
      %c0_24 = arith.constant 0 : index
      %c0_25 = arith.constant 0 : index
      %38 = vector.load %arg7[%c0_24, %c0_25] : memref<16x2xf32, #tpu.memory_space<vmem>>, vector<16x2xf32>
      tpu.vector_store %arg7[%c0_24, %c0_25], %37 {strides = array<i32>} : memref<16x2xf32, #tpu.memory_space<vmem>>, vector<16x2xf32>,
    } else {
    }
    return
  }
  func.func @transform_0(%arg0: i32, %arg1: i32) -> (i32, i32) {
    %c0_i32 = arith.constant 0 : i32
    return %arg0, %arg1 : i32, i32
  }
  func.func @transform_1(%arg0: i32, %arg1: i32) -> (i32, i32) {
    %c0_i32 = arith.constant 0 : i32
    %c0_i32_0 = arith.constant 0 : i32
    return %c0_i32, %arg1 : i32, i32
  }
  func.func @transform_2(%arg0: i32, %arg1: i32) -> (i32, i32) {
    %c0_i32 = arith.constant 0 : i32
    %c0_i32_0 = arith.constant 0 : i32
    %c0_i32_1 = arith.constant 0 : i32
    return %c0_i32, %c0_i32_0 : i32, i32
  }
  func.func @transform_3(%arg0: i32, %arg1: i32) -> (i32, i32) {
    %c0_i32 = arith.constant 0 : i32
    %c0_i32_0 = arith.constant 0 : i32
    %c0_i32_1 = arith.constant 0 : i32
    return %c0_i32, %c0_i32_0 : i32, i32
  }
  func.func @transform_4(%arg0: i32, %arg1: i32) -> (i32, i32) {
    %c0_i32 = arith.constant 0 : i32
    %c0_i32_0 = arith.constant 0 : i32
    %c0_i32_1 = arith.constant 0 : i32
    return %c0_i32, %c0_i32_0 : i32, i32
  }
  func.func @transform_5(%arg0: i32, %arg1: i32) -> (i32, i32) {
    %c0_i32 = arith.constant 0 : i32
    %c0_i32_0 = arith.constant 0 : i32
    return %arg0, %c0_i32 : i32, i32
  }
}

module attributes {stable_mosaic.version = 11 : i64} {
  func.func @domain_classifier_kernel(%arg0: i32, %arg1: i32, %arg2: memref<16x128xbf16, #tpu.memory_space<vmem>>, %arg3: memref<128x128xbf16, #tpu.memory_space<vmem>>, %arg4: memref<1x128xf32, #tpu.memory_space<vmem>>, %arg5: memref<128x128xbf16, #tpu.memory_space<vmem>>, %arg6: memref<1x128xf32, #tpu.memory_space<vmem>>, %arg7: memref<16x2xf32, #tpu.memory_space<vmem>>, %arg8: memref<16x128xf32, #tpu.memory_space<vmem>>) attributes {dimension_semantics = [#tpu.dimension_semantics<parallel>, #tpu.dimension_semantics<arbitrary>], iteration_bounds = array<i64: 1, 1>, scalar_prefetch = 0 : i64, scratch_operands = 1 : i64, tpu.core_type = #tpu.core_type<tc>, window_params = [{transform_indices = @transform_0, window_bounds = array<i64: 16, 128>}, {transform_indices = @transform_1, window_bounds = array<i64: 128, 128>}, {pipeline_mode = #tpu.pipeline_mode<synchronous>, transform_indices = @transform_2, window_bounds = array<i64: 1, 128>}, {pipeline_mode = #tpu.pipeline_mode<synchronous>, transform_indices = @transform_3, window_bounds = array<i64: 128, 128>}, {pipeline_mode = #tpu.pipeline_mode<synchronous>, transform_indices = @transform_4, window_bounds = array<i64: 1, 128>}, {transform_indices = @transform_5, window_bounds = array<i64: 16, 2>}]} {
    %c0_i32 = arith.constant 0 : i32
    %0 = arith.cmpi eq, %arg1, %c0_i32 : i32
    %1 = arith.extui %0 : i1 to i32
    %c0_i32_0 = arith.constant 0 : i32
    %2 = arith.cmpi ne, %1, %c0_i32_0 : i32
    scf.if %2 {
      %cst_10 = arith.constant 0.000000e+00 : f32
      %12 = vector.broadcast %cst_10 : f32 to vector<16x128xf32>
      %c0_11 = arith.constant 0 : index
      %c0_12 = arith.constant 0 : index
      %13 = vector.load %arg8[%c0_11, %c0_12] : memref<16x128xf32, #tpu.memory_space<vmem>>, vector<16x128xf32>
      tpu.vector_store %arg8[%c0_11, %c0_12], %12 {strides = array<i32>} : memref<16x128xf32, #tpu.memory_space<vmem>>, vector<16x128xf32>,
    } else {
    }
    %c0 = arith.constant 0 : index
    %c0_1 = arith.constant 0 : index
    %3 = vector.load %arg8[%c0, %c0_1] : memref<16x128xf32, #tpu.memory_space<vmem>>, vector<16x128xf32>
    %c0_2 = arith.constant 0 : index
    %c0_3 = arith.constant 0 : index
    %4 = vector.load %arg2[%c0_2, %c0_3] : memref<16x128xbf16, #tpu.memory_space<vmem>>, vector<16x128xbf16>
    %c0_4 = arith.constant 0 : index
    %c0_5 = arith.constant 0 : index
    %5 = vector.load %arg3[%c0_4, %c0_5] : memref<128x128xbf16, #tpu.memory_space<vmem>>, vector<128x128xbf16>
    %cst = arith.constant dense<0.000000e+00> : vector<16x128xf32>
    %6 = tpu.matmul %4, %5, %cst {dimension_numbers = #tpu.dot_dimension_numbers<[1], [0], [0], [1], [0, 0, 1, 1], [], []>} : vector<16x128xbf16>, vector<128x128xbf16>, vector<16x128xf32> -> vector<16x128xf32>
    %7 = arith.addf %3, %6 : vector<16x128xf32>
    %c0_6 = arith.constant 0 : index
    %c0_7 = arith.constant 0 : index
    %8 = vector.load %arg8[%c0_6, %c0_7] : memref<16x128xf32, #tpu.memory_space<vmem>>, vector<16x128xf32>
    tpu.vector_store %arg8[%c0_6, %c0_7], %7 {strides = array<i32>} : memref<16x128xf32, #tpu.memory_space<vmem>>, vector<16x128xf32>,
    %c0_i32_8 = arith.constant 0 : i32
    %9 = arith.cmpi eq, %arg1, %c0_i32_8 : i32
    %10 = arith.extui %9 : i1 to i32
    %c0_i32_9 = arith.constant 0 : i32
    %11 = arith.cmpi ne, %10, %c0_i32_9 : i32
    scf.if %11 {
      %c0_10 = arith.constant 0 : index
      %c0_11 = arith.constant 0 : index
      %12 = vector.load %arg8[%c0_10, %c0_11] : memref<16x128xf32, #tpu.memory_space<vmem>>, vector<16x128xf32>
      %c0_12 = arith.constant 0 : index
      %c0_13 = arith.constant 0 : index
      %13 = vector.load %arg4[%c0_12, %c0_13] : memref<1x128xf32, #tpu.memory_space<vmem>>, vector<1x128xf32>
      %14 = vector.broadcast %13 : vector<1x128xf32> to vector<16x128xf32>
      %15 = arith.addf %12, %14 : vector<16x128xf32>
      %cst_14 = arith.constant 0.000000e+00 : f32
      %16 = vector.broadcast %cst_14 : f32 to vector<16x128xf32>
      %17 = arith.cmpf ogt, %15, %16 : vector<16x128xf32>
      %cst_15 = arith.constant 0.00999999977 : f32
      %18 = vector.broadcast %cst_15 : f32 to vector<16x128xf32>
      %19 = arith.mulf %18, %15 : vector<16x128xf32>
      %20 = arith.select %17, %15, %19 : vector<16x128xi1>, vector<16x128xf32>
      %21 = arith.truncf %20 : vector<16x128xf32> to vector<16x128xbf16>
      %c0_16 = arith.constant 0 : index
      %c0_17 = arith.constant 0 : index
      %22 = vector.load %arg5[%c0_16, %c0_17] : memref<128x128xbf16, #tpu.memory_space<vmem>>, vector<128x128xbf16>
      %cst_18 = arith.constant dense<0.000000e+00> : vector<16x128xf32>
      %23 = tpu.matmul %21, %22, %cst_18 {dimension_numbers = #tpu.dot_dimension_numbers<[1], [0], [0], [1], [0, 0, 1, 1], [], []>} : vector<16x128xbf16>, vector<128x128xbf16>, vector<16x128xf32> -> vector<16x128xf32>
      %c0_19 = arith.constant 0 : index
      %c0_20 = arith.constant 0 : index
      %24 = vector.load %arg6[%c0_19, %c0_20] : memref<1x128xf32, #tpu.memory_space<vmem>>, vector<1x128xf32>
      %25 = vector.broadcast %24 : vector<1x128xf32> to vector<16x128xf32>
      %26 = arith.addf %23, %25 : vector<16x128xf32>
      %27 = vector.extract_strided_slice %26 {offsets = [0, 0], sizes = [16, 2], strides = [1, 1]} : vector<16x128xf32> to vector<16x2xf32>
      %cst_21 = arith.constant 0.000000e+00 : f32
      %28 = vector.broadcast %cst_21 : f32 to vector<16x2xf32>
      %29 = arith.maximumf %27, %28 : vector<16x2xf32>
      %30 = math.absf %27 : vector<16x2xf32>
      %cst_22 = arith.constant 0.000000e+00 : f32
      %31 = vector.broadcast %cst_22 : f32 to vector<16x2xf32>
      %32 = arith.subf %31, %30 : vector<16x2xf32>
      %33 = math.exp %32 : vector<16x2xf32>
      %34 = math.log1p %33 : vector<16x2xf32>
      %35 = arith.addf %29, %34 : vector<16x2xf32>
      %cst_23 = arith.constant 0.000000e+00 : f32
      %36 = vector.broadcast %cst_23 : f32 to vector<16x2xf32>
      %37 = arith.subf %36, %35 : vector<16x2xf32>
      %c0_24 = arith.constant 0 : index
      %c0_25 = arith.constant 0 : index
      %38 = vector.load %arg7[%c0_24, %c0_25] : memref<16x2xf32, #tpu.memory_space<vmem>>, vector<16x2xf32>
      tpu.vector_store %arg7[%c0_24, %c0_25], %37 {strides = array<i32>} : memref<16x2xf32, #tpu.memory_space<vmem>>, vector<16x2xf32>,
    } else {
    }
    return
  }
  func.func @transform_0(%arg0: i32, %arg1: i32) -> (i32, i32) {
    %c0_i32 = arith.constant 0 : i32
    return %arg0, %arg1 : i32, i32
  }
  func.func @transform_1(%arg0: i32, %arg1: i32) -> (i32, i32) {
    %c0_i32 = arith.constant 0 : i32
    %c0_i32_0 = arith.constant 0 : i32
    return %c0_i32, %arg1 : i32, i32
  }
  func.func @transform_2(%arg0: i32, %arg1: i32) -> (i32, i32) {
    %c0_i32 = arith.constant 0 : i32
    %c0_i32_0 = arith.constant 0 : i32
    %c0_i32_1 = arith.constant 0 : i32
    return %c0_i32, %c0_i32_0 : i32, i32
  }
  func.func @transform_3(%arg0: i32, %arg1: i32) -> (i32, i32) {
    %c0_i32 = arith.constant 0 : i32
    %c0_i32_0 = arith.constant 0 : i32
    %c0_i32_1 = arith.constant 0 : i32
    return %c0_i32, %c0_i32_0 : i32, i32
  }
  func.func @transform_4(%arg0: i32, %arg1: i32) -> (i32, i32) {
    %c0_i32 = arith.constant 0 : i32
    %c0_i32_0 = arith.constant 0 : i32
    %c0_i32_1 = arith.constant 0 : i32
    return %c0_i32, %c0_i32_0 : i32, i32
  }
  func.func @transform_5(%arg0: i32, %arg1: i32) -> (i32, i32) {
    %c0_i32 = arith.constant 0 : i32
    %c0_i32_0 = arith.constant 0 : i32
    return %arg0, %c0_i32 : i32, i32
  }
}

</mosaic_0001>

<bundles_post_ra>
// kernel: tpu_custom_call.1
= control target key start
LH: loop header
LB: loop body
LE: loop exit
PB: predicated region body
PF: predicated region fallthrough
CT: control target
= control target key end

     0   :  { %10 = vsyncpa [#allocation4], 0  ;;  %s675_s0 = inlined_call_operand.hbm [shape: bf16[8,128], index: 0, kind: input, shape index: {}]   ;;  %s676_s1 = inlined_call_operand.hbm [shape: bf16[128,128], index: 1, kind: input, shape index: {}]   ;;  %s677_s2 = inlined_call_operand.vmem [shape: f32[1,128], index: 2, kind: input, shape index: {}]   ;;  %s678_s3 = inlined_call_operand.hbm [shape: bf16[128,128], index: 3, kind: input, shape index: {}]   ;;  %s679_s4 = inlined_call_operand.vmem [shape: f32[1,128], index: 4, kind: input, shape index: {}]   ;;  %s680_s5 = inlined_call_operand.vmem [shape: f32[8,2], index: 5, kind: output, shape index: {}]  }
   0x1   :  { %11 = vsyncpa [#allocation6], 0 }
   0x2   :  { %16 = vsyncadd [#allocation4], 64  ;;  %s576_s18 = smov [#allocation5]   ;;  %s577_s20 = smov [#allocation3]  }
   0x3   :  { %s29_s19 = sshll.u32 %s576_s18, 4  ;;  %s17_s21 = sshll.u32 %s577_s20, 4  ;;  %s30_s19 = int_to_ptr.vmem [resolvable:$true] %s29_s19  ;;  %s613_s21 = int_to_ptr.vmem [resolvable:$true] %s17_s21 }
   0x4   :  { %s506_s24 = scalar_lea.hbm %s676_s1, 1024 }
   0x5   :  { %p507_p0 = scmp.ne.s32.totalorder %s676_s1, %s506_s24  ;;  %p510_p1 = scmp.lt.u32.totalorder %s506_s24, %s676_s1 }
   0x7   :  { %p512_p2 = pnand %p510_p1, %p507_p0 }
   0x9   :  { %515 = shalt.err (!%p512_p2)
}
   0xa   :  { %s516_s29 = scalar_lea.vmem %s30_s19, 1024  ;;  %p521_p4 = scmp.lt.s32.totalorder %s30_s19, %s30_s19 }
   0xb   :  { %p517_p3 = scmp.ne.s32.totalorder %s30_s19, %s516_s29  ;;  %p522_p5 = scmp.lt.s32.totalorder %s516_s29, %s516_s29 }
   0xd   :  { %p523_p6 = por %p522_p5, %p521_p4 }
   0xf   :  { %p524_p7 = pnand %p523_p6, %p517_p3 }
  0x11   :  { %527 = shalt.err (!%p524_p7)
}
  0x12   :  { %s578_s30 = smov 64   ;;  %s579_s6 = smov 4  }
  0x13   :  { %35 = dma.hbm_to_vmem [thread:$0]  %s676_s1, 1024, %s30_s19, [#allocation6], %s578_s30, %s578_s30, %s579_s6  }
  0x14   :  { %s528_s11 = scalar_lea.hbm %s675_s0, 64 }
  0x15   :  { %p529_p8 = scmp.ne.s32.totalorder %s675_s0, %s528_s11  ;;  %p532_p9 = scmp.lt.u32.totalorder %s528_s11, %s675_s0 }
  0x17   :  { %p534_p10 = pnand %p532_p9, %p529_p8 }
  0x19   :  { %537 = shalt.err (!%p534_p10)
}
  0x1a   :  { %s538_s16 = scalar_lea.vmem %s613_s21, 64  ;;  %s542_s1 = scalar_lea.vmem %s613_s21, 128 }
  0x1b   :  { %p539_p11 = scmp.ne.s32.totalorder %s613_s21, %s538_s16  ;;  %p543_p12 = scmp.lt.s32.totalorder %s613_s21, %s613_s21 }
  0x1c   :  { %p544_p13 = scmp.lt.s32.totalorder %s542_s1, %s538_s16 }
  0x1e   :  { %p545_p0 = por %p544_p13, %p543_p12 }
  0x20   :  { %p546_p1 = pnand %p545_p0, %p539_p11 }
  0x22   :  { %549 = shalt.err (!%p546_p1)
}
  0x23   :  { %23 = dma.hbm_to_vmem [thread:$0]  %s675_s0, 64, %s613_s21, [#allocation4], %s578_s30, %s578_s30, %s579_s6  }
  0x24   :  { %s580_s19 = smov [#allocation7]   ;;  %s550_s24 = scalar_lea.hbm %s678_s3, 1024 }
  0x25   :  { %s43_s20 = sshll.u32 %s580_s19, 4  ;;  %p551_p2 = scmp.ne.s32.totalorder %s678_s3, %s550_s24  ;;  %s44_s20 = int_to_ptr.vmem [resolvable:$true] %s43_s20 }
  0x26   :  { %p554_p3 = scmp.lt.u32.totalorder %s550_s24, %s678_s3 }
  0x28   :  { %p556_p4 = pnand %p554_p3, %p551_p2 }
  0x2a   :  { %559 = shalt.err (!%p556_p4)
}
  0x2b   :  { %s560_s29 = scalar_lea.vmem %s44_s20, 1024  ;;  %p565_p6 = scmp.lt.s32.totalorder %s44_s20, %s44_s20 }
  0x2c   :  { %p561_p5 = scmp.ne.s32.totalorder %s44_s20, %s560_s29  ;;  %p566_p7 = scmp.lt.s32.totalorder %s560_s29, %s560_s29 }
  0x2e   :  { %p567_p8 = por %p566_p7, %p565_p6 }
  0x30   :  { %p568_p9 = pnand %p567_p8, %p561_p5 }
  0x32   :  { %571 = shalt.err (!%p568_p9)
}
  0x33   :  { %49 = dma.hbm_to_vmem [thread:$0]  %s678_s3, 1024, %s44_s20, [#allocation6], %s578_s30, %s578_s30, %s579_s6  }
  0x34   :  { %572 = dma.done.wait [#allocation4], 128  }
  0x35   :  { %573 = vsyncadd [#allocation4], 4294967168 }
  0x36   :  { %574 = dma.done.wait [#allocation6], 2048  }
  0x37   :  { %575 = vsyncadd [#allocation6], 4294965248  ;;  %v581_v0 = vmov 0.0   ;;  %vm582_vm0 = vmmov 0   ;;  %v481_v1 = vld [vmem:[#allocation5] sm:$0xff]   ;;  %v482_v2 = vld [vmem:[#allocation5 + $0x8] sm:$0xff]  }
  0x38   :  { %434 = vmatprep.subr.bf16.mxu0 %v581_v0  ;;  %450 = vmatprep.mubr.msk.bf16.mxu0 %vm582_vm0, %v581_v0  ;;  %v483_v3 = vld [vmem:[#allocation5 + $0x10] sm:$0xff]   ;;  %v490_v4 = vld [vmem:[#allocation7] sm:$0xff]   ;;  %v484_v5 = vld [vmem:[#allocation5 + $0x18] sm:$0xff]   ;;  %vm352_vm4 = vcmask 15360  }
  0x39   :  { %454 = vmatprep.subr.bf16.mxu1 %v581_v0  ;;  %470 = vmatprep.mubr.msk.bf16.mxu1 %vm582_vm0, %v581_v0  ;;  %v491_v6 = vld [vmem:[#allocation7 + $0x8] sm:$0xff]   ;;  %v485_v7 = vld [vmem:[#allocation5 + $0x20] sm:$0xff]   ;;  %v492_v8 = vld [vmem:[#allocation7 + $0x10] sm:$0xff]  }
  0x3a   :  { %435 = vmatpush3.bf16.msra.mxu0 %v481_v1  ;;  %455 = vmatpush3.bf16.msra.mxu1 %v490_v4  ;;  %v486_v9 = vld [vmem:[#allocation5 + $0x28] sm:$0xff]   ;;  %v493_v10 = vld [vmem:[#allocation7 + $0x18] sm:$0xff]   ;;  %v487_v11 = vld [vmem:[#allocation5 + $0x30] sm:$0xff]  }
  0x3b   :  { %436 = vmatprep.subr.bf16.mxu0 %v581_v0  ;;  %456 = vmatprep.subr.bf16.mxu1 %v581_v0  ;;  %v494_v12 = vld [vmem:[#allocation7 + $0x20] sm:$0xff]   ;;  %v488_v13 = vld [vmem:[#allocation5 + $0x38] sm:$0xff]   ;;  %v495_v14 = vld [vmem:[#allocation7 + $0x28] sm:$0xff]  }
  0x3c   :  { %v489_v15 = vld [vmem:[#allocation3] sm:$0xff]   ;;  %v496_v16 = vld [vmem:[#allocation7 + $0x30] sm:$0xff]  }
  0x3d   :  { %v497_v17 = vld [vmem:[#allocation7 + $0x38] sm:$0xff]  }
  0x3e   :  { %437 = vmatpush3.bf16.msra.mxu0 %v482_v2  ;;  %457 = vmatpush3.bf16.msra.mxu1 %v491_v6  ;;  %v406_v18 = vld [vmem:[%s677_s2] ss:$0 sm:$0xff] }
  0x3f   :  { %438 = vmatprep.subr.bf16.mxu0 %v581_v0  ;;  %458 = vmatprep.subr.bf16.mxu1 %v581_v0  ;;  %v407_v30 = vld [vmem:[%s679_s4] ss:$0 sm:$0xff] }
  0x42   :  { %439 = vmatpush3.bf16.msra.mxu0 %v483_v3  ;;  %459 = vmatpush3.bf16.msra.mxu1 %v492_v8 }
  0x43   :  { %440 = vmatprep.subr.bf16.mxu0 %v581_v0  ;;  %460 = vmatprep.subr.bf16.mxu1 %v581_v0 }
  0x46   :  { %441 = vmatpush3.bf16.msra.mxu0 %v484_v5  ;;  %461 = vmatpush3.bf16.msra.mxu1 %v493_v10 }
  0x47   :  { %442 = vmatprep.subr.bf16.mxu0 %v581_v0  ;;  %462 = vmatprep.subr.bf16.mxu1 %v581_v0 }
  0x4a   :  { %443 = vmatpush3.bf16.msra.mxu0 %v485_v7  ;;  %463 = vmatpush3.bf16.msra.mxu1 %v494_v12 }
  0x4b   :  { %444 = vmatprep.subr.bf16.mxu0 %v581_v0  ;;  %464 = vmatprep.subr.bf16.mxu1 %v581_v0 }
  0x4e   :  { %445 = vmatpush3.bf16.msra.mxu0 %v486_v9  ;;  %465 = vmatpush3.bf16.msra.mxu1 %v495_v14 }
  0x4f   :  { %446 = vmatprep.subr.bf16.mxu0 %v581_v0  ;;  %466 = vmatprep.subr.bf16.mxu1 %v581_v0 }
  0x52   :  { %447 = vmatpush3.bf16.msra.mxu0 %v487_v11  ;;  %467 = vmatpush3.bf16.msra.mxu1 %v496_v16 }
  0x53   :  { %448 = vmatprep.subr.bf16.mxu0 %v581_v0  ;;  %468 = vmatprep.subr.bf16.mxu1 %v581_v0 }
  0x56   :  { %449 = vmatpush3.bf16.msra.mxu0 %v488_v13  ;;  %469 = vmatpush3.bf16.msra.mxu1 %v497_v17 }
  0x59   :  { %451 = vmatmul.mubr.bf16.vlgmr.msra.gmra.mrb[0].mxu0 %v489_v15 }
 0x12c   :  { %v176_v19 = vpop.f32.mrb[0].mxu0 }
 0x12d   :  { %v199_v20 = vadd.f32 %v406_v18, %v176_v19  ;;  %v452_v21 = vpop.f32.mrb[1].mxu0 }
 0x12e   :  { %v179_v22 = vpop.f32.mrb[2].mxu0 }
 0x12f   :  { %v203_v23 = vmul.f32 0.01, %v199_v20  ;;  %v200_v24 = vadd.f32 %v406_v18, %v179_v22  ;;  %v453_v25 = vpop.f32.mrb[3].mxu0  ;;  %vm201_vm1 = vcmp.gt.f32.partialorder %v199_v20, 0.0 }
 0x131   :  { %vm202_vm2 = vcmp.gt.f32.partialorder %v200_v24, 0.0  ;;  %v204_v26 = vmul.f32 0.01, %v200_v24  ;;  %v205_v27 = vsel %vm201_vm1, %v199_v20, %v203_v23 }
 0x133   :  { %v206_v28 = vsel %vm202_vm2, %v200_v24, %v204_v26 }
 0x134   :  { %v207_v29 = vpack.c.bf16 %v206_v28, %v205_v27 }
 0x136   :  { %471 = vmatmul.mubr.bf16.vlgmr.msra.gmra.mrb[0].mxu1 %v207_v29 }
 0x209   :  { %v313_v31 = vpop.f32.mrb[0].mxu1 }
 0x20a   :  { %v314_v32 = vadd.f32 %v407_v30, %v313_v31  ;;  %v472_v33 = vpop.f32.mrb[1].mxu1 }
 0x20b   :  { %v316_v34 = vpop.f32.mrb[2].mxu1 }
 0x20c   :  { %v322_v35 = vand.u32 2147483647, %v314_v32  ;;  %v317_v36 = vadd.f32 %v407_v30, %v316_v34  ;;  %v473_v37 = vpop.f32.mrb[3].mxu1  ;;  %v320_v54 = vmax.f32 %v314_v32, 0.0 }
 0x20e   :  { %v324_v38 = vsub.f32 0.0, %v322_v35  ;;  %v323_v39 = vand.u32 2147483647, %v317_v36 }
 0x210   :  { %v326_v40 = vmul.f32 1.442695, %v324_v38  ;;  %v325_v41 = vsub.f32 0.0, %v323_v39 }
 0x212   :  { %498 = vpow2.f32 %v326_v40  ;;  %v328_v42 = vmul.f32 1.442695, %v325_v41 }
 0x214   :  { %500 = vpow2.f32 %v328_v42 }
 0x21c   :  { %v499_v43 = vpop.eup %498 }
 0x21d   :  { %v330_v44 = vadd.f32 1.0, %v499_v43  ;;  %v333_v47 = vmul.f32 -0.5, %v499_v43  ;;  %v336_v49 = vand.u32 2147483647, %v499_v43 }
 0x21e   :  { %v501_v45 = vpop.eup %500 }
 0x21f   :  { %502 = vlog2.f32 %v330_v44  ;;  %v339_v46 = vadd.f32 1.0, %v501_v45  ;;  %v334_v48 = vadd.f32 1.0, %v333_v47  ;;  %vm337_vm3 = vcmp.lt.f32.partialorder %v336_v49, 0.0004427343 }
 0x221   :  { %504 = vlog2.f32 %v339_v46  ;;  %v335_v52 = vmul.f32 %v499_v43, %v334_v48 }
 0x229   :  { %v503_v50 = vpop.eup %502 }
 0x22a   :  { %v332_v51 = vmul.f32 0.6931472, %v503_v50 }
 0x22b   :  { %v505_v53 = vpop.eup %504 }
 0x22c   :  { %v338_v55 = vsel %vm337_vm3, %v335_v52, %v332_v51 }
 0x22d   :  { %v348_v56 = vadd.f32 %v338_v55, %v320_v54 }
 0x22f   :  { %v350_v57 = vsub.f32 0.0, %v348_v56 }
 0x231   :  { %353 = vst.msk [vmem:[#allocation8] sm:$0xff] %vm352_vm4, %v350_v57 }
 0x238   :  { %v384_v58 = vld [vmem:[#allocation8] sm:$0xff] }
 0x239   :  { %385 = vst [vmem:[%s680_s5] sm:$0xff] %v384_v58 }
 0x23a   :  { %391 = vsyncpa [#allocation4], 1 }
 0x23b   :  { %392 = vsyncpa [#allocation6], 1 }

// kernel: tpu_custom_call.1
= control target key start
LH: loop header
LB: loop body
LE: loop exit
PB: predicated region body
PF: predicated region fallthrough
CT: control target
= control target key end

     0   :  { %10 = vsyncpa [#allocation4], 0  ;;  %s675_s0 = inlined_call_operand.hbm [shape: bf16[8,128], index: 0, kind: input, shape index: {}]   ;;  %s676_s1 = inlined_call_operand.hbm [shape: bf16[128,128], index: 1, kind: input, shape index: {}]   ;;  %s677_s2 = inlined_call_operand.vmem [shape: f32[1,128], index: 2, kind: input, shape index: {}]   ;;  %s678_s3 = inlined_call_operand.hbm [shape: bf16[128,128], index: 3, kind: input, shape index: {}]   ;;  %s679_s4 = inlined_call_operand.vmem [shape: f32[1,128], index: 4, kind: input, shape index: {}]   ;;  %s680_s5 = inlined_call_operand.vmem [shape: f32[8,2], index: 5, kind: output, shape index: {}]  }
   0x1   :  { %11 = vsyncpa [#allocation6], 0 }
   0x2   :  { %16 = vsyncadd [#allocation4], 64  ;;  %s576_s18 = smov [#allocation5]   ;;  %s577_s20 = smov [#allocation3]  }
   0x3   :  { %s29_s19 = sshll.u32 %s576_s18, 4  ;;  %s17_s21 = sshll.u32 %s577_s20, 4  ;;  %s30_s19 = int_to_ptr.vmem [resolvable:$true] %s29_s19  ;;  %s613_s21 = int_to_ptr.vmem [resolvable:$true] %s17_s21 }
   0x4   :  { %s506_s24 = scalar_lea.hbm %s676_s1, 1024 }
   0x5   :  { %p507_p0 = scmp.ne.s32.totalorder %s676_s1, %s506_s24  ;;  %p510_p1 = scmp.lt.u32.totalorder %s506_s24, %s676_s1 }
   0x7   :  { %p512_p2 = pnand %p510_p1, %p507_p0 }
   0x9   :  { %515 = shalt.err (!%p512_p2)
}
   0xa   :  { %s516_s29 = scalar_lea.vmem %s30_s19, 1024  ;;  %p521_p4 = scmp.lt.s32.totalorder %s30_s19, %s30_s19 }
   0xb   :  { %p517_p3 = scmp.ne.s32.totalorder %s30_s19, %s516_s29  ;;  %p522_p5 = scmp.lt.s32.totalorder %s516_s29, %s516_s29 }
   0xd   :  { %p523_p6 = por %p522_p5, %p521_p4 }
   0xf   :  { %p524_p7 = pnand %p523_p6, %p517_p3 }
  0x11   :  { %527 = shalt.err (!%p524_p7)
}
  0x12   :  { %s578_s30 = smov 64   ;;  %s579_s6 = smov 4  }
  0x13   :  { %35 = dma.hbm_to_vmem [thread:$0]  %s676_s1, 1024, %s30_s19, [#allocation6], %s578_s30, %s578_s30, %s579_s6  }
  0x14   :  { %s528_s11 = scalar_lea.hbm %s675_s0, 64 }
  0x15   :  { %p529_p8 = scmp.ne.s32.totalorder %s675_s0, %s528_s11  ;;  %p532_p9 = scmp.lt.u32.totalorder %s528_s11, %s675_s0 }
  0x17   :  { %p534_p10 = pnand %p532_p9, %p529_p8 }
  0x19   :  { %537 = shalt.err (!%p534_p10)
}
  0x1a   :  { %s538_s16 = scalar_lea.vmem %s613_s21, 64  ;;  %s542_s1 = scalar_lea.vmem %s613_s21, 128 }
  0x1b   :  { %p539_p11 = scmp.ne.s32.totalorder %s613_s21, %s538_s16  ;;  %p543_p12 = scmp.lt.s32.totalorder %s613_s21, %s613_s21 }
  0x1c   :  { %p544_p13 = scmp.lt.s32.totalorder %s542_s1, %s538_s16 }
  0x1e   :  { %p545_p0 = por %p544_p13, %p543_p12 }
  0x20   :  { %p546_p1 = pnand %p545_p0, %p539_p11 }
  0x22   :  { %549 = shalt.err (!%p546_p1)
}
  0x23   :  { %23 = dma.hbm_to_vmem [thread:$0]  %s675_s0, 64, %s613_s21, [#allocation4], %s578_s30, %s578_s30, %s579_s6  }
  0x24   :  { %s580_s19 = smov [#allocation7]   ;;  %s550_s24 = scalar_lea.hbm %s678_s3, 1024 }
  0x25   :  { %s43_s20 = sshll.u32 %s580_s19, 4  ;;  %p551_p2 = scmp.ne.s32.totalorder %s678_s3, %s550_s24  ;;  %s44_s20 = int_to_ptr.vmem [resolvable:$true] %s43_s20 }
  0x26   :  { %p554_p3 = scmp.lt.u32.totalorder %s550_s24, %s678_s3 }
  0x28   :  { %p556_p4 = pnand %p554_p3, %p551_p2 }
  0x2a   :  { %559 = shalt.err (!%p556_p4)
}
  0x2b   :  { %s560_s29 = scalar_lea.vmem %s44_s20, 1024  ;;  %p565_p6 = scmp.lt.s32.totalorder %s44_s20, %s44_s20 }
  0x2c   :  { %p561_p5 = scmp.ne.s32.totalorder %s44_s20, %s560_s29  ;;  %p566_p7 = scmp.lt.s32.totalorder %s560_s29, %s560_s29 }
  0x2e   :  { %p567_p8 = por %p566_p7, %p565_p6 }
  0x30   :  { %p568_p9 = pnand %p567_p8, %p561_p5 }
  0x32   :  { %571 = shalt.err (!%p568_p9)
}
  0x33   :  { %49 = dma.hbm_to_vmem [thread:$0]  %s678_s3, 1024, %s44_s20, [#allocation6], %s578_s30, %s578_s30, %s579_s6  }
  0x34   :  { %572 = dma.done.wait [#allocation4], 128  }
  0x35   :  { %573 = vsyncadd [#allocation4], 4294967168 }
  0x36   :  { %574 = dma.done.wait [#allocation6], 2048  }
  0x37   :  { %575 = vsyncadd [#allocation6], 4294965248  ;;  %v581_v0 = vmov 0.0   ;;  %vm582_vm0 = vmmov 0   ;;  %v481_v1 = vld [vmem:[#allocation5] sm:$0xff]   ;;  %v482_v2 = vld [vmem:[#allocation5 + $0x8] sm:$0xff]  }
  0x38   :  { %434 = vmatprep.subr.bf16.mxu0 %v581_v0  ;;  %450 = vmatprep.mubr.msk.bf16.mxu0 %vm582_vm0, %v581_v0  ;;  %v483_v3 = vld [vmem:[#allocation5 + $0x10] sm:$0xff]   ;;  %v490_v4 = vld [vmem:[#allocation7] sm:$0xff]   ;;  %v484_v5 = vld [vmem:[#allocation5 + $0x18] sm:$0xff]   ;;  %vm352_vm4 = vcmask 15360  }
  0x39   :  { %454 = vmatprep.subr.bf16.mxu1 %v581_v0  ;;  %470 = vmatprep.mubr.msk.bf16.mxu1 %vm582_vm0, %v581_v0  ;;  %v491_v6 = vld [vmem:[#allocation7 + $0x8] sm:$0xff]   ;;  %v485_v7 = vld [vmem:[#allocation5 + $0x20] sm:$0xff]   ;;  %v492_v8 = vld [vmem:[#allocation7 + $0x10] sm:$0xff]  }
  0x3a   :  { %435 = vmatpush3.bf16.msra.mxu0 %v481_v1  ;;  %455 = vmatpush3.bf16.msra.mxu1 %v490_v4  ;;  %v486_v9 = vld [vmem:[#allocation5 + $0x28] sm:$0xff]   ;;  %v493_v10 = vld [vmem:[#allocation7 + $0x18] sm:$0xff]   ;;  %v487_v11 = vld [vmem:[#allocation5 + $0x30] sm:$0xff]  }
  0x3b   :  { %436 = vmatprep.subr.bf16.mxu0 %v581_v0  ;;  %456 = vmatprep.subr.bf16.mxu1 %v581_v0  ;;  %v494_v12 = vld [vmem:[#allocation7 + $0x20] sm:$0xff]   ;;  %v488_v13 = vld [vmem:[#allocation5 + $0x38] sm:$0xff]   ;;  %v495_v14 = vld [vmem:[#allocation7 + $0x28] sm:$0xff]  }
  0x3c   :  { %v489_v15 = vld [vmem:[#allocation3] sm:$0xff]   ;;  %v496_v16 = vld [vmem:[#allocation7 + $0x30] sm:$0xff]  }
  0x3d   :  { %v497_v17 = vld [vmem:[#allocation7 + $0x38] sm:$0xff]  }
  0x3e   :  { %437 = vmatpush3.bf16.msra.mxu0 %v482_v2  ;;  %457 = vmatpush3.bf16.msra.mxu1 %v491_v6  ;;  %v406_v18 = vld [vmem:[%s677_s2] ss:$0 sm:$0xff] }
  0x3f   :  { %438 = vmatprep.subr.bf16.mxu0 %v581_v0  ;;  %458 = vmatprep.subr.bf16.mxu1 %v581_v0  ;;  %v407_v30 = vld [vmem:[%s679_s4] ss:$0 sm:$0xff] }
  0x42   :  { %439 = vmatpush3.bf16.msra.mxu0 %v483_v3  ;;  %459 = vmatpush3.bf16.msra.mxu1 %v492_v8 }
  0x43   :  { %440 = vmatprep.subr.bf16.mxu0 %v581_v0  ;;  %460 = vmatprep.subr.bf16.mxu1 %v581_v0 }
  0x46   :  { %441 = vmatpush3.bf16.msra.mxu0 %v484_v5  ;;  %461 = vmatpush3.bf16.msra.mxu1 %v493_v10 }
  0x47   :  { %442 = vmatprep.subr.bf16.mxu0 %v581_v0  ;;  %462 = vmatprep.subr.bf16.mxu1 %v581_v0 }
  0x4a   :  { %443 = vmatpush3.bf16.msra.mxu0 %v485_v7  ;;  %463 = vmatpush3.bf16.msra.mxu1 %v494_v12 }
  0x4b   :  { %444 = vmatprep.subr.bf16.mxu0 %v581_v0  ;;  %464 = vmatprep.subr.bf16.mxu1 %v581_v0 }
  0x4e   :  { %445 = vmatpush3.bf16.msra.mxu0 %v486_v9  ;;  %465 = vmatpush3.bf16.msra.mxu1 %v495_v14 }
  0x4f   :  { %446 = vmatprep.subr.bf16.mxu0 %v581_v0  ;;  %466 = vmatprep.subr.bf16.mxu1 %v581_v0 }
  0x52   :  { %447 = vmatpush3.bf16.msra.mxu0 %v487_v11  ;;  %467 = vmatpush3.bf16.msra.mxu1 %v496_v16 }
  0x53   :  { %448 = vmatprep.subr.bf16.mxu0 %v581_v0  ;;  %468 = vmatprep.subr.bf16.mxu1 %v581_v0 }
  0x56   :  { %449 = vmatpush3.bf16.msra.mxu0 %v488_v13  ;;  %469 = vmatpush3.bf16.msra.mxu1 %v497_v17 }
  0x59   :  { %451 = vmatmul.mubr.bf16.vlgmr.msra.gmra.mrb[0].mxu0 %v489_v15 }
 0x12c   :  { %v176_v19 = vpop.f32.mrb[0].mxu0 }
 0x12d   :  { %v199_v20 = vadd.f32 %v406_v18, %v176_v19  ;;  %v452_v21 = vpop.f32.mrb[1].mxu0 }
 0x12e   :  { %v179_v22 = vpop.f32.mrb[2].mxu0 }
 0x12f   :  { %v203_v23 = vmul.f32 0.01, %v199_v20  ;;  %v200_v24 = vadd.f32 %v406_v18, %v179_v22  ;;  %v453_v25 = vpop.f32.mrb[3].mxu0  ;;  %vm201_vm1 = vcmp.gt.f32.partialorder %v199_v20, 0.0 }
 0x131   :  { %vm202_vm2 = vcmp.gt.f32.partialorder %v200_v24, 0.0  ;;  %v204_v26 = vmul.f32 0.01, %v200_v24  ;;  %v205_v27 = vsel %vm201_vm1, %v199_v20, %v203_v23 }
 0x133   :  { %v206_v28 = vsel %vm202_vm2, %v200_v24, %v204_v26 }
 0x134   :  { %v207_v29 = vpack.c.bf16 %v206_v28, %v205_v27 }
 0x136   :  { %471 = vmatmul.mubr.bf16.vlgmr.msra.gmra.mrb[0].mxu1 %v207_v29 }
 0x209   :  { %v313_v31 = vpop.f32.mrb[0].mxu1 }
 0x20a   :  { %v314_v32 = vadd.f32 %v407_v30, %v313_v31  ;;  %v472_v33 = vpop.f32.mrb[1].mxu1 }
 0x20b   :  { %v316_v34 = vpop.f32.mrb[2].mxu1 }
 0x20c   :  { %v322_v35 = vand.u32 2147483647, %v314_v32  ;;  %v317_v36 = vadd.f32 %v407_v30, %v316_v34  ;;  %v473_v37 = vpop.f32.mrb[3].mxu1  ;;  %v320_v54 = vmax.f32 %v314_v32, 0.0 }
 0x20e   :  { %v324_v38 = vsub.f32 0.0, %v322_v35  ;;  %v323_v39 = vand.u32 2147483647, %v317_v36 }
 0x210   :  { %v326_v40 = vmul.f32 1.442695, %v324_v38  ;;  %v325_v41 = vsub.f32 0.0, %v323_v39 }
 0x212   :  { %498 = vpow2.f32 %v326_v40  ;;  %v328_v42 = vmul.f32 1.442695, %v325_v41 }
 0x214   :  { %500 = vpow2.f32 %v328_v42 }
 0x21c   :  { %v499_v43 = vpop.eup %498 }
 0x21d   :  { %v330_v44 = vadd.f32 1.0, %v499_v43  ;;  %v333_v47 = vmul.f32 -0.5, %v499_v43  ;;  %v336_v49 = vand.u32 2147483647, %v499_v43 }
 0x21e   :  { %v501_v45 = vpop.eup %500 }
 0x21f   :  { %502 = vlog2.f32 %v330_v44  ;;  %v339_v46 = vadd.f32 1.0, %v501_v45  ;;  %v334_v48 = vadd.f32 1.0, %v333_v47  ;;  %vm337_vm3 = vcmp.lt.f32.partialorder %v336_v49, 0.0004427343 }
 0x221   :  { %504 = vlog2.f32 %v339_v46  ;;  %v335_v52 = vmul.f32 %v499_v43, %v334_v48 }
 0x229   :  { %v503_v50 = vpop.eup %502 }
 0x22a   :  { %v332_v51 = vmul.f32 0.6931472, %v503_v50 }
 0x22b   :  { %v505_v53 = vpop.eup %504 }
 0x22c   :  { %v338_v55 = vsel %vm337_vm3, %v335_v52, %v332_v51 }
 0x22d   :  { %v348_v56 = vadd.f32 %v338_v55, %v320_v54 }
 0x22f   :  { %v350_v57 = vsub.f32 0.0, %v348_v56 }
 0x231   :  { %353 = vst.msk [vmem:[#allocation8] sm:$0xff] %vm352_vm4, %v350_v57 }
 0x238   :  { %v384_v58 = vld [vmem:[#allocation8] sm:$0xff] }
 0x239   :  { %385 = vst [vmem:[%s680_s5] sm:$0xff] %v384_v58 }
 0x23a   :  { %391 = vsyncpa [#allocation4], 1 }
 0x23b   :  { %392 = vsyncpa [#allocation6], 1 }

</bundles_post_ra>
